<compile_context>
chip_gen: v6e
topology: v6e:2x2x1
jax: 0.10.0
libtpu: 0.0.40
codegen_flags: <defaults>
</compile_context>

<pallas_src>
import math
from functools import partial

import jax
import jax.numpy as jnp
from jax import lax
from jax.experimental import pallas as pl
from jax.experimental.pallas import tpu as pltpu


def _self_attention_kernel(num_heads, head_dim,
                           h_ref, wqkv_ref, bqkv_ref, wo_ref, bo_ref,
                           bias_ref, mask_ref, o_ref,
                           q_scr, k_scr, v_scr):
    """Grid = (batch, head). One head of one batch element per step."""
    H, D = num_heads, head_dim
    _, S, E = h_ref.shape
    hd = pl.program_id(1)
    scale = 1.0 / math.sqrt(D)

    @pl.when(hd == 0)
    def _project_qkv():
        # One wide bf16 MXU matmul for Q, K, V of this batch element.
        h = h_ref[0]                                            # (S, E) bf16
        qkv = jnp.dot(h, wqkv_ref[...],
                      preferred_element_type=jnp.float32) + bqkv_ref[0]
        q = qkv[:, 0:E] * scale                                 # scale applied once
        k = qkv[:, E:2 * E]
        v = qkv[:, 2 * E:3 * E]
        for j in range(H):                                      # static head split
            sl = slice(j * D, (j + 1) * D)
            q_scr[j] = q[:, sl].astype(q_scr.dtype)
            k_scr[j] = k[:, sl].astype(k_scr.dtype)
            v_scr[j] = v[:, sl].astype(v_scr.dtype)
        # Start the per-head accumulation from the output-projection bias.
        o_ref[0] = jnp.broadcast_to(bo_ref[...], (S, E)).astype(o_ref.dtype)

    qh = q_scr[hd]                                              # (S, D) bf16
    kh = k_scr[hd]
    vh = v_scr[hd]

    # q @ k^T without an explicit transpose (contract dim 1 of both operands).
    scores = lax.dot_general(qh, kh, (((1,), (1,)), ((), ())),
                             preferred_element_type=jnp.float32)    # (S, S) f32
    # spatial attention bias + additive mask (finite -1e30, precomputed).
    scores = scores + bias_ref[0, 0] + mask_ref[0, 0]

    # Numerically stable f32 softmax; reciprocal goes to the EUP.
    m = jnp.max(scores, axis=-1, keepdims=True)
    e = jnp.exp(scores - m)
    denom = jnp.sum(e, axis=-1, keepdims=True)
    probs = e * pl.reciprocal(denom, approx=True)
    # dropout(p=0.0) is identity

    ctx = jnp.dot(probs.astype(jnp.bfloat16), vh,
                  preferred_element_type=jnp.float32)               # (S, D) f32
    # This head's slab of the output projection, accumulated into the
    # resident output block (no concat, no masked lane stores).
    contrib = jnp.dot(ctx.astype(jnp.bfloat16), wo_ref[0],
                      preferred_element_type=jnp.float32)           # (S, E) f32
    o_ref[0] = o_ref[0] + contrib.astype(o_ref.dtype)


def layoutlmv2_self_attention(hidden, params, attn_bias, attn_mask, num_heads):
    B, S, E = hidden.shape
    H = num_heads
    D = E // H
    wq, bq, wk, bk, wv, bv, wo, bo = params

    # One-time parameter repacking outside the kernel:
    #  - pre-transpose (nn.Linear does x @ W^T) so the kernel never transposes
    #  - pack Wq/Wk/Wv into a single (E, 3E) bf16 operand
    #  - split Wo^T into per-head (D, E) slabs streamed by the head grid axis
    wqkv_t = jnp.concatenate([wq.T, wk.T, wv.T], axis=1).astype(jnp.bfloat16)  # (E, 3E)
    bqkv = jnp.concatenate([bq, bk, bv], axis=1).astype(jnp.float32)           # (1, 3E)
    wo_t_heads = wo.T.reshape(H, D, E).astype(jnp.bfloat16)                    # (H, D, E)
    bo_f32 = bo.astype(jnp.float32)                                            # (1, E)
    hidden_bf16 = hidden.astype(jnp.bfloat16)
    # Additive mask: finite large-negative avoids NaN on fully-masked rows.
    mask_add = jnp.where(attn_mask != 0, jnp.float32(-1e30), jnp.float32(0.0))
    attn_bias_f32 = attn_bias.astype(jnp.float32)

    kernel = partial(_self_attention_kernel, H, D)

    flops = B * (8 * S * E * E + 4 * S * S * E)
    bytes_accessed = (hidden_bf16.size * 2 + wqkv_t.size * 2 + wo_t_heads.size * 2
                      + bqkv.size * 4 + bo_f32.size * 4
                      + attn_bias_f32.size * 4 + mask_add.size * 4
                      + B * S * E * 4)
    cost = pl.CostEstimate(flops=flops, transcendentals=B * H * S * S,
                           bytes_accessed=bytes_accessed)

    return pl.pallas_call(
        kernel,
        out_shape=jax.ShapeDtypeStruct((B, S, E), jnp.float32),
        grid=(B, H),
        in_specs=[
            pl.BlockSpec((1, S, E), lambda b, h: (b, 0, 0)),        # hidden (bf16)
            pl.BlockSpec((E, 3 * E), lambda b, h: (0, 0)),          # packed W_qkv^T
            pl.BlockSpec((1, 3 * E), lambda b, h: (0, 0)),          # packed b_qkv
            pl.BlockSpec((1, D, E), lambda b, h: (h, 0, 0)),        # Wo^T head slab
            pl.BlockSpec((1, E), lambda b, h: (0, 0)),              # bo
            pl.BlockSpec((1, 1, S, S), lambda b, h: (b, h, 0, 0)),  # spatial bias
            pl.BlockSpec((1, 1, S, S), lambda b, h: (b, 0, 0, 0)),  # additive mask
        ],
        out_specs=pl.BlockSpec((1, S, E), lambda b, h: (b, 0, 0)),
        scratch_shapes=[
            pltpu.VMEM((H, S, D), jnp.bfloat16),   # q (pre-scaled), split per head
            pltpu.VMEM((H, S, D), jnp.bfloat16),   # k
            pltpu.VMEM((H, S, D), jnp.bfloat16),   # v
        ],
        compiler_params=pltpu.CompilerParams(
            dimension_semantics=("parallel", "arbitrary"),
            vmem_limit_bytes=64 * 1024 * 1024),
        cost_estimate=cost,
    )(hidden_bf16, wqkv_t, bqkv, wo_t_heads, bo_f32, attn_bias_f32, mask_add)


def reference_self_attention(hidden, params, attn_bias, attn_mask, num_heads):
    """Pure-JAX f32 reference mirroring the PyTorch forward."""
    B, S, E = hidden.shape
    H = num_heads
    D = E // H
    wq, bq, wk, bk, wv, bv, wo, bo = params
    q = hidden @ wq.T + bq[0]
    k = hidden @ wk.T + bk[0]
    v = hidden @ wv.T + bv[0]

    def to_heads(x):
        return x.reshape(B, S, H, D).transpose(0, 2, 1, 3)   # (B,H,S,D)

    qh, kh, vh = to_heads(q), to_heads(k), to_heads(v)
    qh = qh / math.sqrt(D)
    scores = jnp.einsum('bhqd,bhkd->bhqk', qh, kh)
    scores = scores + attn_bias
    scores = jnp.where(attn_mask != 0, -jnp.inf, scores)
    probs = jax.nn.softmax(scores.astype(jnp.float32), axis=-1)
    ctx = jnp.einsum('bhqk,bhkd->bhqd', probs, vh)
    ctx = ctx.transpose(0, 2, 1, 3).reshape(B, S, E)
    return ctx @ wo.T + bo[0]


if __name__ == "__main__":
    B, S, E, H = 2, 8, 32, 4   # batch, seq, embed_dim, num_heads
    key = jax.random.PRNGKey(0)
    keys = jax.random.split(key, 12)

    hidden = jax.random.normal(keys[0], (B, S, E), jnp.float32)

    def lin_init(kw, kb):
        w = jax.random.normal(kw, (E, E), jnp.float32) * 0.02
        b = jax.random.normal(kb, (1, E), jnp.float32) * 0.02
        return w, b

    wq, bq = lin_init(keys[1], keys[2])
    wk, bk = lin_init(keys[3], keys[4])
    wv, bv = lin_init(keys[5], keys[6])
    wo, bo = lin_init(keys[7], keys[8])
    params = (wq, bq, wk, bk, wv, bv, wo, bo)

    # spatial attention bias (B, H, S, S)
    attn_bias = jax.random.normal(keys[9], (B, H, S, S), jnp.float32) * 0.1
    # attention mask: mask out the last key position for every query (nonzero => masked)
    attn_mask = jnp.zeros((B, 1, S, S), jnp.float32).at[:, :, :, -1].set(1.0)

    out = layoutlmv2_self_attention(hidden, params, attn_bias, attn_mask, H)
    out = jax.block_until_ready(out)

    ref = reference_self_attention(hidden, params, attn_bias, attn_mask, H)
    assert out.shape == (B, S, E)
    # bf16 MXU operands => compare against the f32 reference with a loose tol.
    assert jnp.allclose(out, ref, atol=1e-2, rtol=1e-2), "mismatch vs reference"

    print("KERNEL_OK")
</pallas_src>

<mosaic_0001>
module attributes {stable_mosaic.version = 11 : i64} {
  func.func @_self_attention_kernel(%arg0: i32, %arg1: i32, %arg2: memref<1x8x32xbf16, #tpu.memory_space<vmem>>, %arg3: memref<32x96xbf16, #tpu.memory_space<vmem>>, %arg4: memref<1x96xf32, #tpu.memory_space<vmem>>, %arg5: memref<1x8x32xbf16, #tpu.memory_space<vmem>>, %arg6: memref<1x32xf32, #tpu.memory_space<vmem>>, %arg7: memref<1x1x8x8xf32, #tpu.memory_space<vmem>>, %arg8: memref<1x1x8x8xf32, #tpu.memory_space<vmem>>, %arg9: memref<1x8x32xf32, #tpu.memory_space<vmem>>, %arg10: memref<4x8x8xbf16, #tpu.memory_space<vmem>>, %arg11: memref<4x8x8xbf16, #tpu.memory_space<vmem>>, %arg12: memref<4x8x8xbf16, #tpu.memory_space<vmem>>) attributes {dimension_semantics = [#tpu.dimension_semantics<parallel>, #tpu.dimension_semantics<arbitrary>], iteration_bounds = array<i64: 2, 4>, scalar_prefetch = 0 : i64, scratch_operands = 3 : i64, tpu.core_type = #tpu.core_type<tc>, window_params = [{transform_indices = @transform_0, window_bounds = array<i64: 1, 8, 32>}, {pipeline_mode = #tpu.pipeline_mode<synchronous>, transform_indices = @transform_1, window_bounds = array<i64: 32, 96>}, {pipeline_mode = #tpu.pipeline_mode<synchronous>, transform_indices = @transform_2, window_bounds = array<i64: 1, 96>}, {transform_indices = @transform_3, window_bounds = array<i64: 1, 8, 32>}, {pipeline_mode = #tpu.pipeline_mode<synchronous>, transform_indices = @transform_4, window_bounds = array<i64: 1, 32>}, {transform_indices = @transform_5, window_bounds = array<i64: 1, 1, 8, 8>}, {transform_indices = @transform_6, window_bounds = array<i64: 1, 1, 8, 8>}, {transform_indices = @transform_7, window_bounds = array<i64: 1, 8, 32>}]} {
    %c0_i32 = arith.constant 0 : i32
    %0 = arith.cmpi eq, %arg1, %c0_i32 : i32
    %1 = arith.extui %0 : i1 to i32
    %c0_i32_0 = arith.constant 0 : i32
    %2 = arith.cmpi ne, %1, %c0_i32_0 : i32
    scf.if %2 {
      %c0_27 = arith.constant 0 : index
      %c0_28 = arith.constant 0 : index
      %c0_29 = arith.constant 0 : index
      %41 = vector.load %arg2[%c0_27, %c0_28, %c0_29] : memref<1x8x32xbf16, #tpu.memory_space<vmem>>, vector<1x8x32xbf16>
      %42 = vector.shape_cast %41 : vector<1x8x32xbf16> to vector<8x32xbf16>
      %c0_30 = arith.constant 0 : index
      %c0_31 = arith.constant 0 : index
      %43 = vector.load %arg3[%c0_30, %c0_31] : memref<32x96xbf16, #tpu.memory_space<vmem>>, vector<32x96xbf16>
      %cst_32 = arith.constant dense<0.000000e+00> : vector<8x96xf32>
      %44 = tpu.matmul %42, %43, %cst_32 {dimension_numbers = #tpu.dot_dimension_numbers<[1], [0], [0], [1], [0, 0, 1, 1], [], []>} : vector<8x32xbf16>, vector<32x96xbf16>, vector<8x96xf32> -> vector<8x96xf32>
      %c0_33 = arith.constant 0 : index
      %c0_34 = arith.constant 0 : index
      %45 = vector.load %arg4[%c0_33, %c0_34] : memref<1x96xf32, #tpu.memory_space<vmem>>, vector<1x96xf32>
      %46 = vector.shape_cast %45 : vector<1x96xf32> to vector<96xf32>
      %47 = vector.shape_cast %46 : vector<96xf32> to vector<1x96xf32>
      %48 = vector.broadcast %47 : vector<1x96xf32> to vector<8x96xf32>
      %49 = arith.addf %44, %48 : vector<8x96xf32>
      %50 = vector.extract_strided_slice %49 {offsets = [0, 0], sizes = [8, 32], strides = [1, 1]} : vector<8x96xf32> to vector<8x32xf32>
      %cst_35 = arith.constant 0.353553385 : f32
      %51 = vector.broadcast %cst_35 : f32 to vector<8x32xf32>
      %52 = arith.mulf %50, %51 : vector<8x32xf32>
      %53 = vector.extract_strided_slice %49 {offsets = [0, 32], sizes = [8, 32], strides = [1, 1]} : vector<8x96xf32> to vector<8x32xf32>
      %54 = vector.extract_strided_slice %49 {offsets = [0, 64], sizes = [8, 32], strides = [1, 1]} : vector<8x96xf32> to vector<8x32xf32>
      %55 = vector.extract_strided_slice %52 {offsets = [0, 0], sizes = [8, 8], strides = [1, 1]} : vector<8x32xf32> to vector<8x8xf32>
      %56 = arith.truncf %55 : vector<8x8xf32> to vector<8x8xbf16>
      %c0_36 = arith.constant 0 : index
      %c0_37 = arith.constant 0 : index
      %c0_38 = arith.constant 0 : index
      %57 = vector.load %arg10[%c0_36, %c0_37, %c0_38] : memref<4x8x8xbf16, #tpu.memory_space<vmem>>, vector<1x8x8xbf16>
      %58 = vector.shape_cast %57 : vector<1x8x8xbf16> to vector<8x8xbf16>
      %59 = vector.shape_cast %56 : vector<8x8xbf16> to vector<1x8x8xbf16>
      tpu.vector_store %arg10[%c0_36, %c0_37, %c0_38], %59 {strides = array<i32>} : memref<4x8x8xbf16, #tpu.memory_space<vmem>>, vector<1x8x8xbf16>,
      %60 = vector.extract_strided_slice %53 {offsets = [0, 0], sizes = [8, 8], strides = [1, 1]} : vector<8x32xf32> to vector<8x8xf32>
      %61 = arith.truncf %60 : vector<8x8xf32> to vector<8x8xbf16>
      %c0_39 = arith.constant 0 : index
      %c0_40 = arith.constant 0 : index
      %c0_41 = arith.constant 0 : index
      %62 = vector.load %arg11[%c0_39, %c0_40, %c0_41] : memref<4x8x8xbf16, #tpu.memory_space<vmem>>, vector<1x8x8xbf16>
      %63 = vector.shape_cast %62 : vector<1x8x8xbf16> to vector<8x8xbf16>
      %64 = vector.shape_cast %61 : vector<8x8xbf16> to vector<1x8x8xbf16>
      tpu.vector_store %arg11[%c0_39, %c0_40, %c0_41], %64 {strides = array<i32>} : memref<4x8x8xbf16, #tpu.memory_space<vmem>>, vector<1x8x8xbf16>,
      %65 = vector.extract_strided_slice %54 {offsets = [0, 0], sizes = [8, 8], strides = [1, 1]} : vector<8x32xf32> to vector<8x8xf32>
      %66 = arith.truncf %65 : vector<8x8xf32> to vector<8x8xbf16>
      %c0_42 = arith.constant 0 : index
      %c0_43 = arith.constant 0 : index
      %c0_44 = arith.constant 0 : index
      %67 = vector.load %arg12[%c0_42, %c0_43, %c0_44] : memref<4x8x8xbf16, #tpu.memory_space<vmem>>, vector<1x8x8xbf16>
      %68 = vector.shape_cast %67 : vector<1x8x8xbf16> to vector<8x8xbf16>
      %69 = vector.shape_cast %66 : vector<8x8xbf16> to vector<1x8x8xbf16>
      tpu.vector_store %arg12[%c0_42, %c0_43, %c0_44], %69 {strides = array<i32>} : memref<4x8x8xbf16, #tpu.memory_space<vmem>>, vector<1x8x8xbf16>,
      %70 = vector.extract_strided_slice %52 {offsets = [0, 8], sizes = [8, 8], strides = [1, 1]} : vector<8x32xf32> to vector<8x8xf32>
      %71 = arith.truncf %70 : vector<8x8xf32> to vector<8x8xbf16>
      %c1 = arith.constant 1 : index
      %c0_45 = arith.constant 0 : index
      %c0_46 = arith.constant 0 : index
      %72 = vector.load %arg10[%c1, %c0_45, %c0_46] : memref<4x8x8xbf16, #tpu.memory_space<vmem>>, vector<1x8x8xbf16>
      %73 = vector.shape_cast %72 : vector<1x8x8xbf16> to vector<8x8xbf16>
      %74 = vector.shape_cast %71 : vector<8x8xbf16> to vector<1x8x8xbf16>
      tpu.vector_store %arg10[%c1, %c0_45, %c0_46], %74 {strides = array<i32>} : memref<4x8x8xbf16, #tpu.memory_space<vmem>>, vector<1x8x8xbf16>,
      %75 = vector.extract_strided_slice %53 {offsets = [0, 8], sizes = [8, 8], strides = [1, 1]} : vector<8x32xf32> to vector<8x8xf32>
      %76 = arith.truncf %75 : vector<8x8xf32> to vector<8x8xbf16>
      %c1_47 = arith.constant 1 : index
      %c0_48 = arith.constant 0 : index
      %c0_49 = arith.constant 0 : index
      %77 = vector.load %arg11[%c1_47, %c0_48, %c0_49] : memref<4x8x8xbf16, #tpu.memory_space<vmem>>, vector<1x8x8xbf16>
      %78 = vector.shape_cast %77 : vector<1x8x8xbf16> to vector<8x8xbf16>
      %79 = vector.shape_cast %76 : vector<8x8xbf16> to vector<1x8x8xbf16>
      tpu.vector_store %arg11[%c1_47, %c0_48, %c0_49], %79 {strides = array<i32>} : memref<4x8x8xbf16, #tpu.memory_space<vmem>>, vector<1x8x8xbf16>,
      %80 = vector.extract_strided_slice %54 {offsets = [0, 8], sizes = [8, 8], strides = [1, 1]} : vector<8x32xf32> to vector<8x8xf32>
      %81 = arith.truncf %80 : vector<8x8xf32> to vector<8x8xbf16>
      %c1_50 = arith.constant 1 : index
      %c0_51 = arith.constant 0 : index
      %c0_52 = arith.constant 0 : index
      %82 = vector.load %arg12[%c1_50, %c0_51, %c0_52] : memref<4x8x8xbf16, #tpu.memory_space<vmem>>, vector<1x8x8xbf16>
      %83 = vector.shape_cast %82 : vector<1x8x8xbf16> to vector<8x8xbf16>
      %84 = vector.shape_cast %81 : vector<8x8xbf16> to vector<1x8x8xbf16>
      tpu.vector_store %arg12[%c1_50, %c0_51, %c0_52], %84 {strides = array<i32>} : memref<4x8x8xbf16, #tpu.memory_space<vmem>>, vector<1x8x8xbf16>,
      %85 = vector.extract_strided_slice %52 {offsets = [0, 16], sizes = [8, 8], strides = [1, 1]} : vector<8x32xf32> to vector<8x8xf32>
      %86 = arith.truncf %85 : vector<8x8xf32> to vector<8x8xbf16>
      %c2 = arith.constant 2 : index
      %c0_53 = arith.constant 0 : index
      %c0_54 = arith.constant 0 : index
      %87 = vector.load %arg10[%c2, %c0_53, %c0_54] : memref<4x8x8xbf16, #tpu.memory_space<vmem>>, vector<1x8x8xbf16>
      %88 = vector.shape_cast %87 : vector<1x8x8xbf16> to vector<8x8xbf16>
      %89 = vector.shape_cast %86 : vector<8x8xbf16> to vector<1x8x8xbf16>
      tpu.vector_store %arg10[%c2, %c0_53, %c0_54], %89 {strides = array<i32>} : memref<4x8x8xbf16, #tpu.memory_space<vmem>>, vector<1x8x8xbf16>,
      %90 = vector.extract_strided_slice %53 {offsets = [0, 16], sizes = [8, 8], strides = [1, 1]} : vector<8x32xf32> to vector<8x8xf32>
      %91 = arith.truncf %90 : vector<8x8xf32> to vector<8x8xbf16>
      %c2_55 = arith.constant 2 : index
      %c0_56 = arith.constant 0 : index
      %c0_57 = arith.constant 0 : index
      %92 = vector.load %arg11[%c2_55, %c0_56, %c0_57] : memref<4x8x8xbf16, #tpu.memory_space<vmem>>, vector<1x8x8xbf16>
      %93 = vector.shape_cast %92 : vector<1x8x8xbf16> to vector<8x8xbf16>
      %94 = vector.shape_cast %91 : vector<8x8xbf16> to vector<1x8x8xbf16>
      tpu.vector_store %arg11[%c2_55, %c0_56, %c0_57], %94 {strides = array<i32>} : memref<4x8x8xbf16, #tpu.memory_space<vmem>>, vector<1x8x8xbf16>,
      %95 = vector.extract_strided_slice %54 {offsets = [0, 16], sizes = [8, 8], strides = [1, 1]} : vector<8x32xf32> to vector<8x8xf32>
      %96 = arith.truncf %95 : vector<8x8xf32> to vector<8x8xbf16>
      %c2_58 = arith.constant 2 : index
      %c0_59 = arith.constant 0 : index
      %c0_60 = arith.constant 0 : index
      %97 = vector.load %arg12[%c2_58, %c0_59, %c0_60] : memref<4x8x8xbf16, #tpu.memory_space<vmem>>, vector<1x8x8xbf16>
      %98 = vector.shape_cast %97 : vector<1x8x8xbf16> to vector<8x8xbf16>
      %99 = vector.shape_cast %96 : vector<8x8xbf16> to vector<1x8x8xbf16>
      tpu.vector_store %arg12[%c2_58, %c0_59, %c0_60], %99 {strides = array<i32>} : memref<4x8x8xbf16, #tpu.memory_space<vmem>>, vector<1x8x8xbf16>,
      %100 = vector.extract_strided_slice %52 {offsets = [0, 24], sizes = [8, 8], strides = [1, 1]} : vector<8x32xf32> to vector<8x8xf32>
      %101 = arith.truncf %100 : vector<8x8xf32> to vector<8x8xbf16>
      %c3 = arith.constant 3 : index
      %c0_61 = arith.constant 0 : index
      %c0_62 = arith.constant 0 : index
      %102 = vector.load %arg10[%c3, %c0_61, %c0_62] : memref<4x8x8xbf16, #tpu.memory_space<vmem>>, vector<1x8x8xbf16>
      %103 = vector.shape_cast %102 : vector<1x8x8xbf16> to vector<8x8xbf16>
      %104 = vector.shape_cast %101 : vector<8x8xbf16> to vector<1x8x8xbf16>
      tpu.vector_store %arg10[%c3, %c0_61, %c0_62], %104 {strides = array<i32>} : memref<4x8x8xbf16, #tpu.memory_space<vmem>>, vector<1x8x8xbf16>,
      %105 = vector.extract_strided_slice %53 {offsets = [0, 24], sizes = [8, 8], strides = [1, 1]} : vector<8x32xf32> to vector<8x8xf32>
      %106 = arith.truncf %105 : vector<8x8xf32> to vector<8x8xbf16>
      %c3_63 = arith.constant 3 : index
      %c0_64 = arith.constant 0 : index
      %c0_65 = arith.constant 0 : index
      %107 = vector.load %arg11[%c3_63, %c0_64, %c0_65] : memref<4x8x8xbf16, #tpu.memory_space<vmem>>, vector<1x8x8xbf16>
      %108 = vector.shape_cast %107 : vector<1x8x8xbf16> to vector<8x8xbf16>
      %109 = vector.shape_cast %106 : vector<8x8xbf16> to vector<1x8x8xbf16>
      tpu.vector_store %arg11[%c3_63, %c0_64, %c0_65], %109 {strides = array<i32>} : memref<4x8x8xbf16, #tpu.memory_space<vmem>>, vector<1x8x8xbf16>,
      %110 = vector.extract_strided_slice %54 {offsets = [0, 24], sizes = [8, 8], strides = [1, 1]} : vector<8x32xf32> to vector<8x8xf32>
      %111 = arith.truncf %110 : vector<8x8xf32> to vector<8x8xbf16>
      %c3_66 = arith.constant 3 : index
      %c0_67 = arith.constant 0 : index
      %c0_68 = arith.constant 0 : index
      %112 = vector.load %arg12[%c3_66, %c0_67, %c0_68] : memref<4x8x8xbf16, #tpu.memory_space<vmem>>, vector<1x8x8xbf16>
      %113 = vector.shape_cast %112 : vector<1x8x8xbf16> to vector<8x8xbf16>
      %114 = vector.shape_cast %111 : vector<8x8xbf16> to vector<1x8x8xbf16>
      tpu.vector_store %arg12[%c3_66, %c0_67, %c0_68], %114 {strides = array<i32>} : memref<4x8x8xbf16, #tpu.memory_space<vmem>>, vector<1x8x8xbf16>,
      %c0_69 = arith.constant 0 : index
      %c0_70 = arith.constant 0 : index
      %115 = vector.load %arg6[%c0_69, %c0_70] : memref<1x32xf32, #tpu.memory_space<vmem>>, vector<1x32xf32>
      %116 = vector.shape_cast %115 : vector<1x32xf32> to vector<1x32xf32>
      %117 = vector.broadcast %116 : vector<1x32xf32> to vector<8x32xf32>
      %c0_71 = arith.constant 0 : index
      %c0_72 = arith.constant 0 : index
      %c0_73 = arith.constant 0 : index
      %118 = vector.load %arg9[%c0_71, %c0_72, %c0_73] : memref<1x8x32xf32, #tpu.memory_space<vmem>>, vector<1x8x32xf32>
      %119 = vector.shape_cast %118 : vector<1x8x32xf32> to vector<8x32xf32>
      %120 = vector.shape_cast %117 : vector<8x32xf32> to vector<1x8x32xf32>
      tpu.vector_store %arg9[%c0_71, %c0_72, %c0_73], %120 {strides = array<i32>} : memref<1x8x32xf32, #tpu.memory_space<vmem>>, vector<1x8x32xf32>,
    } else {
    }
    %3 = arith.index_cast %arg1 : i32 to index
    %c0 = arith.constant 0 : index
    %c0_1 = arith.constant 0 : index
    %4 = vector.load %arg10[%3, %c0, %c0_1] : memref<4x8x8xbf16, #tpu.memory_space<vmem>>, vector<1x8x8xbf16>
    %5 = vector.shape_cast %4 : vector<1x8x8xbf16> to vector<8x8xbf16>
    %6 = arith.index_cast %arg1 : i32 to index
    %c0_2 = arith.constant 0 : index
    %c0_3 = arith.constant 0 : index
    %7 = vector.load %arg11[%6, %c0_2, %c0_3] : memref<4x8x8xbf16, #tpu.memory_space<vmem>>, vector<1x8x8xbf16>
    %8 = vector.shape_cast %7 : vector<1x8x8xbf16> to vector<8x8xbf16>
    %9 = arith.index_cast %arg1 : i32 to index
    %c0_4 = arith.constant 0 : index
    %c0_5 = arith.constant 0 : index
    %10 = vector.load %arg12[%9, %c0_4, %c0_5] : memref<4x8x8xbf16, #tpu.memory_space<vmem>>, vector<1x8x8xbf16>
    %11 = vector.shape_cast %10 : vector<1x8x8xbf16> to vector<8x8xbf16>
    %cst = arith.constant dense<0.000000e+00> : vector<8x8xf32>
    %12 = tpu.matmul %5, %8, %cst {dimension_numbers = #tpu.dot_dimension_numbers<[1], [1], [0], [0], [0, 0, 1, 0], [], []>} : vector<8x8xbf16>, vector<8x8xbf16>, vector<8x8xf32> -> vector<8x8xf32>
    %c0_6 = arith.constant 0 : index
    %c0_7 = arith.constant 0 : index
    %c0_8 = arith.constant 0 : index
    %c0_9 = arith.constant 0 : index
    %13 = vector.load %arg7[%c0_6, %c0_7, %c0_8, %c0_9] : memref<1x1x8x8xf32, #tpu.memory_space<vmem>>, vector<1x1x8x8xf32>
    %14 = vector.shape_cast %13 : vector<1x1x8x8xf32> to vector<8x8xf32>
    %15 = arith.addf %12, %14 : vector<8x8xf32>
    %c0_10 = arith.constant 0 : index
    %c0_11 = arith.constant 0 : index
    %c0_12 = arith.constant 0 : index
    %c0_13 = arith.constant 0 : index
    %16 = vector.load %arg8[%c0_10, %c0_11, %c0_12, %c0_13] : memref<1x1x8x8xf32, #tpu.memory_space<vmem>>, vector<1x1x8x8xf32>
    %17 = vector.shape_cast %16 : vector<1x1x8x8xf32> to vector<8x8xf32>
    %18 = arith.addf %15, %17 : vector<8x8xf32>
    %cst_14 = arith.constant dense<0xFF800000> : vector<8xf32>
    %19 = vector.multi_reduction <maximumf>, %18, %cst_14 [1] : vector<8x8xf32> to vector<8xf32>
    %20 = vector.shape_cast %19 : vector<8xf32> to vector<8x1xf32>
    %21 = vector.broadcast %20 : vector<8x1xf32> to vector<8x8xf32>
    %22 = arith.subf %18, %21 : vector<8x8xf32>
    %23 = math.exp %22 : vector<8x8xf32>
    %cst_15 = arith.constant dense<0.000000e+00> : vector<8xf32>
    %24 = vector.multi_reduction <add>, %23, %cst_15 [1] : vector<8x8xf32> to vector<8xf32>
    %25 = vector.shape_cast %24 : vector<8xf32> to vector<8x1xf32>
    %26 = tpu.reciprocal %25 {approx = true} : vector<8x1xf32> -> vector<8x1xf32>
    %27 = vector.broadcast %26 : vector<8x1xf32> to vector<8x8xf32>
    %28 = arith.mulf %23, %27 : vector<8x8xf32>
    %29 = arith.truncf %28 : vector<8x8xf32> to vector<8x8xbf16>
    %cst_16 = arith.constant dense<0.000000e+00> : vector<8x8xf32>
    %30 = tpu.matmul %29, %11, %cst_16 {dimension_numbers = #tpu.dot_dimension_numbers<[1], [0], [0], [1], [0, 0, 1, 1], [], []>} : vector<8x8xbf16>, vector<8x8xbf16>, vector<8x8xf32> -> vector<8x8xf32>
    %31 = arith.truncf %30 : vector<8x8xf32> to vector<8x8xbf16>
    %c0_17 = arith.constant 0 : index
    %c0_18 = arith.constant 0 : index
    %c0_19 = arith.constant 0 : index
    %32 = vector.load %arg5[%c0_17, %c0_18, %c0_19] : memref<1x8x32xbf16, #tpu.memory_space<vmem>>, vector<1x8x32xbf16>
    %33 = vector.shape_cast %32 : vector<1x8x32xbf16> to vector<8x32xbf16>
    %cst_20 = arith.constant dense<0.000000e+00> : vector<8x32xf32>
    %34 = tpu.matmul %31, %33, %cst_20 {dimension_numbers = #tpu.dot_dimension_numbers<[1], [0], [0], [1], [0, 0, 1, 1], [], []>} : vector<8x8xbf16>, vector<8x32xbf16>, vector<8x32xf32> -> vector<8x32xf32>
    %c0_21 = arith.constant 0 : index
    %c0_22 = arith.constant 0 : index
    %c0_23 = arith.constant 0 : index
    %35 = vector.load %arg9[%c0_21, %c0_22, %c0_23] : memref<1x8x32xf32, #tpu.memory_space<vmem>>, vector<1x8x32xf32>
    %36 = vector.shape_cast %35 : vector<1x8x32xf32> to vector<8x32xf32>
    %37 = arith.addf %36, %34 : vector<8x32xf32>
    %c0_24 = arith.constant 0 : index
    %c0_25 = arith.constant 0 : index
    %c0_26 = arith.constant 0 : index
    %38 = vector.load %arg9[%c0_24, %c0_25, %c0_26] : memref<1x8x32xf32, #tpu.memory_space<vmem>>, vector<1x8x32xf32>
    %39 = vector.shape_cast %38 : vector<1x8x32xf32> to vector<8x32xf32>
    %40 = vector.shape_cast %37 : vector<8x32xf32> to vector<1x8x32xf32>
    tpu.vector_store %arg9[%c0_24, %c0_25, %c0_26], %40 {strides = array<i32>} : memref<1x8x32xf32, #tpu.memory_space<vmem>>, vector<1x8x32xf32>,
    return
  }
  func.func @transform_0(%arg0: i32, %arg1: i32) -> (i32, i32, i32) {
    %c0_i32 = arith.constant 0 : i32
    %c0_i32_0 = arith.constant 0 : i32
    %c0_i32_1 = arith.constant 0 : i32
    return %arg0, %c0_i32, %c0_i32_0 : i32, i32, i32
  }
  func.func @transform_1(%arg0: i32, %arg1: i32) -> (i32, i32) {
    %c0_i32 = arith.constant 0 : i32
    %c0_i32_0 = arith.constant 0 : i32
    %c0_i32_1 = arith.constant 0 : i32
    return %c0_i32, %c0_i32_0 : i32, i32
  }
  func.func @transform_2(%arg0: i32, %arg1: i32) -> (i32, i32) {
    %c0_i32 = arith.constant 0 : i32
    %c0_i32_0 = arith.constant 0 : i32
    %c0_i32_1 = arith.constant 0 : i32
    return %c0_i32, %c0_i32_0 : i32, i32
  }
  func.func @transform_3(%arg0: i32, %arg1: i32) -> (i32, i32, i32) {
    %c0_i32 = arith.constant 0 : i32
    %c0_i32_0 = arith.constant 0 : i32
    %c0_i32_1 = arith.constant 0 : i32
    return %arg1, %c0_i32, %c0_i32_0 : i32, i32, i32
  }
  func.func @transform_4(%arg0: i32, %arg1: i32) -> (i32, i32) {
    %c0_i32 = arith.constant 0 : i32
    %c0_i32_0 = arith.constant 0 : i32
    %c0_i32_1 = arith.constant 0 : i32
    return %c0_i32, %c0_i32_0 : i32, i32
  }
  func.func @transform_5(%arg0: i32, %arg1: i32) -> (i32, i32, i32, i32) {
    %c0_i32 = arith.constant 0 : i32
    %c0_i32_0 = arith.constant 0 : i32
    %c0_i32_1 = arith.constant 0 : i32
    return %arg0, %arg1, %c0_i32, %c0_i32_0 : i32, i32, i32, i32
  }
  func.func @transform_6(%arg0: i32, %arg1: i32) -> (i32, i32, i32, i32) {
    %c0_i32 = arith.constant 0 : i32
    %c0_i32_0 = arith.constant 0 : i32
    %c0_i32_1 = arith.constant 0 : i32
    %c0_i32_2 = arith.constant 0 : i32
    return %arg0, %c0_i32, %c0_i32_0, %c0_i32_1 : i32, i32, i32, i32
  }
  func.func @transform_7(%arg0: i32, %arg1: i32) -> (i32, i32, i32) {
    %c0_i32 = arith.constant 0 : i32
    %c0_i32_0 = arith.constant 0 : i32
    %c0_i32_1 = arith.constant 0 : i32
    return %arg0, %c0_i32, %c0_i32_0 : i32, i32, i32
  }
}

</mosaic_0001>

<bundles_post_ra>
// kernel: tpu_custom_call.1
= control target key start
LH: loop header
LB: loop body
LE: loop exit
PB: predicated region body
PF: predicated region fallthrough
CT: control target
= control target key end

     0   :  { %s1954_s0 = inlined_call_operand.hbm [shape: bf16[2,8,32], index: 0, kind: input, shape index: {}]   ;;  %s1955_s1 = inlined_call_operand.hbm [shape: bf16[32,96], index: 1, kind: input, shape index: {}]   ;;  %s1956_s2 = inlined_call_operand.vmem [shape: f32[1,96], index: 2, kind: input, shape index: {}]   ;;  %s1957_s3 = inlined_call_operand.hbm [shape: bf16[4,8,32], index: 3, kind: input, shape index: {}]   ;;  %s1958_s4 = inlined_call_operand.vmem [shape: f32[1,32], index: 4, kind: input, shape index: {}]   ;;  %s1959_s5 = inlined_call_operand.hbm [shape: f32[2,4,8,8], index: 5, kind: input, shape index: {}]   ;;  %s1960_s6 = inlined_call_operand.hbm [shape: f32[2,1,8,8], index: 6, kind: input, shape index: {}]   ;;  %s1961_s7 = inlined_call_operand.hbm [shape: f32[2,8,32], index: 7, kind: output, shape index: {}]  }
   0x1   :  { %1984 = sst [smem:[#allocation31_spill]] %s1954_s0 }
   0x2   :  { %1985 = sst [smem:[#allocation32_spill]] %s1955_s1 }
   0x3   :  { %1986 = sst [smem:[#allocation33_spill]] %s1956_s2 }
   0x4   :  { %1987 = sst [smem:[#allocation34_spill]] %s1957_s3 }
   0x5   :  { %1988 = sst [smem:[#allocation35_spill]] %s1958_s4 }
   0x6   :  { %1989 = sst [smem:[#allocation36_spill]] %s1961_s7 }
   0x7   :  { %12 = vsyncpa [#allocation6], 0 }
   0x8   :  { %14 = vsyncpa [#allocation6 + $0x1], 0 }
   0x9   :  { %15 = vsyncpa [#allocation9], 0 }
   0xa   :  { %16 = vsyncpa [#allocation7], 0 }
   0xb   :  { %18 = vsyncpa [#allocation7 + $0x1], 0  ;;  %s1529_s24 = smov 0   ;;  %s1531_s25 = smov 0  }
   0xc   :  { %s1533_s26 = smov 0   ;;  %s1535_s27 = smov 0  }
   0xd   :  { %s1537_s28 = smov 0   ;;  %s1539_s29 = smov 0  }
   0xe   :  { %s1541_s30 = smov 0   ;;  %s1543_s8 = smov 0  }
   0xf   :  { %s1545_s9 = smov 0   ;;  %s1547_s10 = smov 0  }
  0x10   :  { %s1549_s11 = smov 0   ;;  %s1551_s12 = smov 0  }
  0x11   :  { %s1553_s13 = smov 0   ;;  %s1555_s14 = smov 0  }
  0x12 LB: > { %1990 = sst [smem:[#allocation20_spill]] %s1428_s28  ;;  %s1600_s15 = sadd.s32 4294967295, %s1464_s14   ;;  %s1464_s14 = sphi %s1555_s14, %s24_s14   ;;  %s1460_s13 = sphi %s1553_s13, %s2059_s13   ;;  %s1456_s12 = sphi %s1551_s12, %s2058_s12   ;;  %s1452_s11 = sphi %s1549_s11, %s2057_s11   ;;  %s1448_s10 = sphi %s1547_s10, %s2056_s10   ;;  %s1444_s9 = sphi %s1545_s9, %s2055_s9   ;;  %s1440_s8 = sphi %s1543_s8, %s2054_s8   ;;  %s1436_s30 = sphi %s1541_s30, %s2047_s30   ;;  %s1432_s29 = sphi %s1539_s29, %s2053_s29   ;;  %s1428_s28 = sphi %s1537_s28, %s2052_s28   ;;  %s1424_s27 = sphi %s1535_s27, %s2046_s27   ;;  %s1420_s26 = sphi %s1533_s26, %s2051_s26   ;;  %s1416_s25 = sphi %s1531_s25, %s2050_s25   ;;  %s1412_s24 = sphi %s1529_s24, %s2049_s24  }
  0x13   : > { %1991 = sst [smem:[#allocation21_spill]] %s1436_s30  ;;  %s916_s16 = sadd.s32 4294967294, %s1464_s14  }
  0x14   : > { %1992 = sst [smem:[#allocation22_spill]] %s1440_s8  ;;  %p50_p0 = scmp.ne.s32.totalorder %s1444_s9, %s1440_s8 }
  0x15   : > { %1993 = sst [smem:[#allocation23_spill]] %s1448_s10  ;;  %p1980_p1 = scmp.eq.s32.totalorder %s1464_s14, 0 }
  0x16   : > { %1994 = sst [smem:[#allocation24_spill]] %s1452_s11  ;;  %p56_p2 = scmp.ne.s32.totalorder %s1440_s8, %s1436_s30 }
  0x17   : > { %p1979_p3 = scmp.eq.s32.totalorder %s1600_s15, 0  ;;  %p223_p4 = scmp.eq.s32.totalorder %s1600_s15, 7 }
  0x18   : > { %p1612_p5 = por %p1980_p1, %p50_p0  ;;  %p229_p6 = scmp.eq.s32.totalorder %s916_s16, 7 }
  0x19   : > { %p1618_p7 = por %p1979_p3, %p56_p2  ;;  %p1622_p8 = por %p223_p4, %p50_p0 }
  0x1a   : > { %p1626_p9 = por %p229_p6, %p56_p2  ;;  %p1968_p10 = scmp.lt.s32.totalorder %s1464_s14, 8 }
  0x1b   : > { %s1996_s18 = scalar_select %p1618_p7, 1, 0 }
  0x1c   : > { %s1998_s19 = scalar_select %p1622_p8, 1, 0 }
  0x1d   : > { %1997 = sst [smem:[#allocation25_spill]] %s1996_s18  ;;  %s268_s21 = sand.u32 1, %s1464_s14  }
  0x1e   : > { %1999 = sst [smem:[#allocation26_spill]] %s1998_s19  ;;  %s1967_s22 = sand.u32 1, %s1444_s9  }
  0x1f   : > { %s2000_s20 = scalar_select %p1626_p9, 1, 0 }
  0x20   : > { %s920_s23 = sshll.u32 %s1967_s22, 2  ;;  %s921_s30 = sshll.u32 %s1460_s13, 6 }
  0x21   : > { %2001 = sst [smem:[#allocation27_spill]] %s2000_s20  ;;  %s272_s2 = scalar_lea.vmem [#allocation5], %s920_s23 }
  0x22   : > { %s2002_s0 = sld [smem:[#allocation31_spill]]  ;;  %s279_s4 = sshll.u32 %s272_s2, 4  ;;  %s280_s4 = int_to_ptr.vmem [resolvable:$true] %s279_s4 }
  0x23   : > { %p1643_p11 = pnand %p1968_p10, %p1612_p5  ;;  %s1648_s10 = scalar_lea.sflag [#allocation6], %s268_s21 }
  0x24   : > { %s1179_s22 = scalar_lea.vmem %s280_s4, 64  ;;  %s1466_s2 = smov [#allocation5]  }
  0x25   : > { %s2003_s19 = scalar_select %p1643_p11, 1, 0 }
  0x26   : > { %p1978_p12 = pneg %p1643_p11  ;;  %p1180_p13 = scmp.ne.s32.totalorder %s280_s4, %s1179_s22 }
  0x27   : > { %2004 = sst [smem:[#allocation28_spill]] %s2003_s19  ;;  %s1184_s7 = sshll.u32 %s1466_s2, 4  ;;  %s1185_s7 = int_to_ptr.vmem [resolvable:$false] %s1184_s7 }
  0x28   : > { %s277_s11 = scalar_lea.hbm %s2002_s0, %s921_s30  ;;  %p1182_p0 = pnand %p1180_p13, %p1978_p12 }
  0x29   : > { %s1186_s30 = scalar_lea.vmem %s1185_s7, 128  ;;  %p1187_p4 = scmp.lt.s32.totalorder %s280_s4, %s1185_s7 }
  0x2a   : > { %p1183_p2 = pneg %p1182_p0  ;;  %p1188_p5 = scmp.lt.s32.totalorder %s1186_s30, %s1179_s22 }
  0x2c   : > { %p1189_p6 = por %p1188_p5, %p1187_p4 }
  0x2e   : > { %p1190_p10 = pnand %p1189_p6, %p1183_p2 }
  0x30   : > { %1193 = shalt.err (!%p1190_p10)
}
  0x31   : > { %1012 = dma.hbm_to_vmem [thread:$0]  (!%p1643_p11), %s277_s11, 64, %s280_s4, %s1648_s10  }
  0x32   : > { %s33_s17 = sadd.s32 1, %s1456_s12  ;;  %s36_s21 = sadd.s32 1, %s1460_s13 }
  0x33   : > { %p34_p10 = scmp.ge.s32.totalorder %s33_s17, 4  ;;  %s111_s22 = sadd.s32 1, %s1432_s29 }
  0x34   : > { %p118_p13 = scmp.ne.s32.totalorder %s1432_s29, %s1428_s28  ;;  %p124_p0 = scmp.ne.s32.totalorder %s1428_s28, %s1424_s27 }
  0x35   : > { %s2061_s17 = smov (%p34_p10, %s33_s17), 0  ;;  %s2063_s21 = smov (!%p34_p10, %s36_s21), %s1460_s13 }
  0x36   : > { %2005 = sst [smem:[#allocation29_spill]] %s2061_s17  ;;  %s108_s23 = ssub.s32 %s1456_s12, %s2061_s17 }
  0x37   : > { %p1672_p2 = por %p118_p13, %p1980_p1  ;;  %p38_p4 = scmp.ge.s32.totalorder %s2063_s21, 2 }
  0x38   : > { %p109_p5 = scmp.eq.s32.totalorder %s108_s23, 0  ;;  %p1678_p6 = por %p124_p0, %p1979_p3 }
  0x39   : > { %s288_s27 = sand.u32 1, %s1432_s29   ;;  %s2065_s21 = smov (%p38_p4, %s2063_s21), 0 }
  0x3a   : > { %s2007_s4 = scalar_select %p1678_p6, 1, 0 }
  0x3b   : > { %s1686_s11 = scalar_select %p109_p5, %s1432_s29, %s111_s22  }
  0x3c   : > { %2008 = sst [smem:[#allocation30_spill]] %s2007_s4  ;;  %s40_s2 = ssub.s32 %s1460_s13, %s2065_s21 }
  0x3d   : > { %s922_s7 = sshll.u32 %s288_s27, 2  ;;  %p41_p10 = scmp.eq.s32.totalorder %s40_s2, 0 }
  0x3e   : > { %s157_s30 = sor.u32 %s108_s23, %s40_s2  ;;  %s2010_s0 = sadd.s32 1, %s1444_s9 }
  0x3f   : > { %p1690_p13 = scmp.eq.s32.totalorder %s157_s30, 0  ;;  %s923_s28 = sshll.u32 %s1456_s12, 6 }
  0x40   : > { %s1697_s17 = scalar_select %p41_p10, %s1444_s9, %s2010_s0  }
  0x41   : > { %s290_s18 = scalar_lea.vmem [#allocation10], %s922_s7  ;;  %s2011_s3 = sld [smem:[#allocation34_spill]] }
  0x42   : > { %s297_s4 = sshll.u32 %s290_s18, 4  ;;  %p2012_p0 = scmp.lt.s32.totalorder %s1464_s14, 8  ;;  %s298_s4 = int_to_ptr.vmem [resolvable:$true] %s297_s4 }
  0x43   : > { %s1207_s23 = scalar_lea.vmem %s298_s4, 64  ;;  %s1467_s0 = smov [#allocation10]  }
  0x44   : > { %p1707_p4 = pnand %p2012_p0, %p1672_p2  ;;  %p1208_p10 = scmp.ne.s32.totalorder %s298_s4, %s1207_s23 }
  0x45   : > { %s1212_s18 = sshll.u32 %s1467_s0, 4  ;;  %s1213_s18 = int_to_ptr.vmem [resolvable:$false] %s1212_s18 }
  0x46   : > { %p1196_p5 = pneg %p1707_p4  ;;  %s1214_s27 = scalar_lea.vmem %s1213_s18, 128 }
  0x47   : > { %s295_s19 = scalar_lea.hbm %s2011_s3, %s923_s28  ;;  %p1215_p1 = scmp.lt.s32.totalorder %s298_s4, %s1213_s18 }
  0x48   : > { %p1210_p12 = pnand %p1208_p10, %p1196_p5  ;;  %p1216_p9 = scmp.lt.s32.totalorder %s1214_s27, %s1207_s23 }
  0x4a   : > { %p1211_p3 = pneg %p1210_p12  ;;  %p1217_p8 = por %p1216_p9, %p1215_p1 }
  0x4c   : > { %p1218_p6 = pnand %p1217_p8, %p1211_p3 }
  0x4e   : > { %1221 = shalt.err (!%p1218_p6)
}
  0x4f   : > { %1015 = dma.hbm_to_vmem [thread:$0]  (!%p1707_p4), %s295_s19, 64, %s298_s4, %s1648_s10  }
  0x50   : > { %s160_s1 = sadd.s32 1, %s1420_s26  ;;  %p167_p1 = scmp.ne.s32.totalorder %s1420_s26, %s1416_s25 }
  0x51   : > { %s1722_s28 = scalar_select %p1690_p13, %s1420_s26, %s160_s1  }
  0x52   : > { %p2014_p3 = scmp.eq.s32.totalorder %s1464_s14, 0  ;;  %p173_p9 = scmp.ne.s32.totalorder %s1416_s25, %s1412_s24 }
  0x53   : > { %s306_s8 = sand.u32 1, %s1420_s26   ;;  %s925_s16 = sshll.u32 %s1460_s13, 2 }
  0x54   : > { %p169_p8 = por %p167_p1, %p2014_p3  ;;  %p2015_p12 = scmp.eq.s32.totalorder %s1600_s15, 0 }
  0x55   : > { %s924_s7 = sshll.u32 %s306_s8, 3  ;;  %s313_s30 = sadd.s32 %s1456_s12, %s925_s16 }
  0x56   : > { %p1732_p2 = por %p173_p9, %p2015_p12  ;;  %s926_s22 = sshll.u32 %s313_s30, 7 }
  0x57   : > { %s308_s19 = scalar_lea.vmem [#allocation11], %s924_s7  ;;  %s315_s20 = scalar_lea.hbm %s1959_s5, %s926_s22 }
  0x58   : > { %s2016_s2 = scalar_select %p1732_p2, 1, 0 }
  0x59   : > { %s317_s4 = sshll.u32 %s308_s19, 4  ;;  %p2017_p6 = pmov %p2012_p0  ;;  %s318_s4 = int_to_ptr.vmem [resolvable:$true] %s317_s4 }
  0x5a   : > { %s1235_s18 = scalar_lea.vmem %s318_s4, 128  ;;  %s1468_s27 = smov [#allocation11]  }
  0x5b   : > { %p1742_p13 = pnand %p2017_p6, %p169_p8  ;;  %p1236_p4 = scmp.ne.s32.totalorder %s318_s4, %s1235_s18 }
  0x5c   : > { %s1240_s1 = sshll.u32 %s1468_s27, 4  ;;  %s1241_s1 = int_to_ptr.vmem [resolvable:$false] %s1240_s1 }
  0x5d   : > { %p1224_p0 = pneg %p1742_p13  ;;  %s1242_s8 = scalar_lea.vmem %s1241_s1, 256 }
  0x5e   : > { %p1243_p1 = scmp.lt.s32.totalorder %s318_s4, %s1241_s1  ;;  %p1244_p3 = scmp.lt.s32.totalorder %s1242_s8, %s1235_s18 }
  0x5f   : > { %p1238_p5 = pnand %p1236_p4, %p1224_p0 }
  0x60   : > { %p1245_p9 = por %p1244_p3, %p1243_p1 }
  0x61   : > { %p1239_p10 = pneg %p1238_p5 }
  0x63   : > { %p1246_p12 = pnand %p1245_p9, %p1239_p10 }
  0x65   : > { %1249 = shalt.err (!%p1246_p12)
}
  0x66   : > { %1018 = dma.hbm_to_vmem [thread:$0]  (!%p1742_p13), %s315_s20, 128, %s318_s4, %s1648_s10  }
  0x67   : > { %p917_p8 = scmp.ge.s32.totalorder %s1464_s14, 1  ;;  %p236_p6 = scmp.lt.s32.totalorder %s1464_s14, 9 }
  0x68   : > { %s2019_s16 = sand.u32 1, %s1444_s9   ;;  %s1469_s22 = smov [#allocation8]  }
  0x69   : > { %s927_s7 = sshll.u32 %s2019_s16, 3  ;;  %p1755_p0 = pnand %p917_p8, %p236_p6 }
  0x6a   : > { %s248_s19 = sshll.u32 %s1469_s22, 4  ;;  %s928_s23 = sshll.u32 %s1460_s13, 7  ;;  %s249_s19 = int_to_ptr.vmem [resolvable:$true] %s248_s19 }
  0x6b   : > { %p1005_p4 = pneg %p1755_p0  ;;  %s328_s0 = scalar_lea.vmem [#allocation12], %s927_s7 }
  0x6c   : > { %s335_s24 = sshll.u32 %s328_s0, 4  ;;  %p2021_p5 = scmp.eq.s32.totalorder %s1600_s15, 0  ;;  %s336_s24 = int_to_ptr.vmem [resolvable:$true] %s335_s24 }
  0x6d   : > { %s1771_s27 = scalar_lea.hbm %s1960_s6, %s928_s23  ;;  %s1261_s1 = scalar_lea.vmem %s249_s19, 256 }
  0x6e   : > { %p1764_p10 = pnand %p1005_p4, %p2021_p5  ;;  %p1262_p1 = scmp.ne.s32.totalorder %s249_s19, %s1261_s1 }
  0x6f   : > { %p1269_p12 = scmp.lt.s32.totalorder %s249_s19, %s249_s19  ;;  %p1270_p8 = scmp.lt.s32.totalorder %s1261_s1, %s1261_s1 }
  0x70   : > { %p1252_p13 = pneg %p1764_p10 }
  0x71   : > { %p1271_p6 = por %p1270_p8, %p1269_p12 }
  0x72   : > { %p1264_p3 = pnand %p1262_p1, %p1252_p13 }
  0x74   : > { %p1265_p9 = pneg %p1264_p3 }
  0x76   : > { %p1272_p4 = pnand %p1271_p6, %p1265_p9 }
  0x78   : > { %1275 = shalt.err (!%p1272_p4)
}
  0x79   : > { %s1470_s8 = smov 64   ;;  %s1471_s7 = smov 4  }
  0x7a   : > { %s2024_s0 = sld [smem:[#allocation32_spill]]  ;;  %s1289_s20 = scalar_lea.vmem %s336_s24, 128 }
  0x7b   : > { %p1290_p5 = scmp.ne.s32.totalorder %s336_s24, %s1289_s20  ;;  %p2025_p2 = pneg %p1643_p11 }
  0x7c   : > { %s1472_s18 = smov [#allocation12]  }
  0x7d   : > { %p1292_p13 = pnand %p1290_p5, %p2025_p2  ;;  %s1294_s1 = sshll.u32 %s1472_s18, 4  ;;  %s1295_s1 = int_to_ptr.vmem [resolvable:$false] %s1294_s1 }
  0x7e   : > { %s1296_s3 = scalar_lea.vmem %s1295_s1, 256  ;;  %p1297_p3 = scmp.lt.s32.totalorder %s336_s24, %s1295_s1 }
  0x7f   : > { %p1293_p1 = pneg %p1292_p13  ;;  %p1298_p9 = scmp.lt.s32.totalorder %s1296_s3, %s1289_s20 }
  0x80   : > { %1008 = dma.hbm_to_vmem [thread:$0]  (!%p1764_p10), %s2024_s0, 256, %s249_s19, [#allocation9], %s1470_s8, %s1470_s8, %s1471_s7  }
  0x81   : > { %p1299_p12 = por %p1298_p9, %p1297_p3 }
  0x83   : > { %p1300_p8 = pnand %p1299_p12, %p1293_p1 }
  0x85   : > { %1303 = shalt.err (!%p1300_p8)
}
  0x86   : > { %1021 = dma.hbm_to_vmem [thread:$0]  (!%p1643_p11), %s1771_s27, 128, %s336_s24, %s1648_s10  }
  0x87   : > { %344 = sbr.rel (%p1755_p0) target bundleno = 1452 (0x5ac), region = 48  ;;  %s2026_s19 = sld [smem:[#allocation22_spill]] (!%p1755_p0) }
  0x88   : > { %s346_s8 = sand.u32 (!%p1755_p0), 1, %s1600_s15  }
  0x89   : > { %s347_s3 = scalar_lea.sflag (!%p1755_p0), [#allocation6], %s346_s8 }
  0x8d   : > { %s1791_s7 = sand.u32 1, %s2026_s19  }
  0x8e   : > { %s930_s22 = sshll.u32 %s1791_s7, 2 }
  0x8f   : > { %s1794_s23 = scalar_lea.vmem [#allocation5], %s930_s22 }
  0x90   : > { %1387 = dma.done.wait (%p1618_p7), %s347_s3, 64  }
  0x91   : > { %1389 = vsyncadd (%p1618_p7), %s347_s3, 4294967232  ;;  %p2028_p11 = scmp.eq.s32.totalorder %s1600_s15, 0 }
  0x93   : > { %1391 = dma.done.wait (%p2028_p11), [#allocation9], 256   ;;  %p2029_p2 = pmov %p2028_p11 }
  0x94   : > { %s2030_s10 = sld [smem:[#allocation20_spill]] }
  0x95   : > { %1393 = vsyncadd (%p2029_p2), [#allocation9], 4294967040  ;;  %s2031_s30 = sld [smem:[#allocation30_spill]] }
  0x9a   : > { %s361_s24 = sand.u32 1, %s2030_s10  }
  0x9b   : > { %s1805_s27 = sshll.u32 %s361_s24, 2  ;;  %p2032_p0 = scmp.ne.s32.totalorder %s2031_s30, 0 }
  0x9c   : > { %s363_s16 = scalar_lea.vmem [#allocation10], %s1805_s27 }
  0x9d   : > { %1395 = dma.done.wait (%p2032_p0), %s347_s3, 64  }
  0x9e   : > { %1397 = vsyncadd (%p2032_p0), %s347_s3, 4294967232  ;;  %s370_s0 = sand.u32 1, %s1416_s25   ;;  %p2033_p10 = scmp.ne.s32.totalorder %s2016_s2, 0 }
  0x9f   : > { %s1813_s20 = sshll.u32 %s370_s0, 3 }
  0xa0   : > { %s372_s15 = scalar_lea.vmem [#allocation11], %s1813_s20 }
  0xa1   : > { %1399 = dma.done.wait (%p2033_p10), %s347_s3, 128  }
  0xa2   : > { %1401 = vsyncadd (%p2033_p10), %s347_s3, 4294967168  ;;  %s934_s18 = sshll.u32 %s1791_s7, 3 }
  0xa3   : > { %s1821_s1 = scalar_lea.vmem [#allocation12], %s934_s18 }
  0xa4   : > { %1403 = dma.done.wait (%p1618_p7), %s347_s3, 128  }
  0xa5   : > { %1405 = vsyncadd (%p1618_p7), %s347_s3, 4294967168  ;;  %s1827_s19 = scalar_lea.vmem [#allocation13], %s934_s18  ;;  %s2034_s8 = sld [smem:[#allocation23_spill]] }
  0xab   : > { %p936_p6 = scmp.ne.s32.totalorder %s2034_s8, 0 }
  0xac   : > { %s2035_s10 = sld [smem:[#allocation35_spill]] (!%p936_p6)  ;;  %s1475_s24 = smov (!%p936_p6), 88  }
  0xad   : > { %431 = sbr.rel (%p936_p6) target bundleno = 520 (0x208), region = 72  ;;  %s2036_s30 = sld [smem:[#allocation33_spill]] (!%p936_p6) }
  0xae   : > { %s1476_s0 = smov (!%p936_p6), 96   ;;  %s1478_s18 = smov (!%p936_p6), 64  }
  0xaf   : > { %s1479_s8 = smov (!%p936_p6), 56   ;;  %s1480_s2 = smov (!%p936_p6), 120  }
  0xb0   : > { %s1481_s22 = smov (!%p936_p6), 80   ;;  %s1483_s4 = smov (!%p936_p6), 104  }
  0xb1   : > { %s1484_s3 = smov (!%p936_p6), 72  }
  0xb2   : > { %v1160_v0 = vld [vmem:[#allocation8 + $0x8] sm:$0xff]   ;;  %v1473_v1 = vmov 0.0   ;;  %v1161_v2 = vld [vmem:[#allocation8] sm:$0xff]   ;;  %vm1474_vm0 = vmmov 0   ;;  %vm456_vm1 = vcmask 261120   ;;  %vm502_vm2 = vcmask 60416  }
  0xb3   : > { %965 = vmatprep.subr.bf16.mxu0 %v1473_v1  ;;  %969 = vmatprep.mubr.msk.bf16.mxu0 %vm1474_vm0, %v1473_v1  ;;  %v943_v3 = vld [vmem:[%s2035_s10] ss:$0 sm:$0xff]  ;;  %v432_v4 = vld [vmem:[%s1794_s23] sm:$0xf]  ;;  %s1477_s23 = smov 48   ;;  %s1482_s10 = smov 112  }
  0xb4   : > { %966 = vmatpush3.bf16.msra.mxu0 %v1160_v0  ;;  %571 = vst.msk [vmem:[%s1827_s19] sm:$0xff] %vm456_vm1, %v943_v3  ;;  %v937_v5 = vld [vmem:[%s2036_s30] ss:$0 sm:$0xff]  ;;  %s1485_s30 = smov 40  }
  0xb5   : > { %967 = vmatprep.subr.bf16.mxu0 %v1473_v1 }
  0xb8   : > { %968 = vmatpush3.bf16.msra.mxu0 %v1161_v2 }
  0xbb   : > { %970 = vmatmul.mubr.msk.bf16.vlgmr.msra.gmra.mxu0 %vm456_vm1, %v432_v4 }
 0x17b   : > { %v494_v6 = vpop.f32.mrf.mxu0 }
 0x17c   : > { %v495_v7 = vadd.f32 %v937_v5, %v494_v6 }
 0x17d   : > { %v971_v8 = vpop.f32.mrf.mxu0 }
 0x17e   : > { %v500_v9 = vmul.f32 0.35355338, %v495_v7  ;;  %v954_v10 = vpack.c.bf16 %v495_v7, %v495_v7 }
 0x17f   : > { %v497_v11 = vpop.f32.mrf.mxu0 }
 0x180   : > { %v501_v12 = vpack.c.bf16 %v500_v9, %v500_v9  ;;  %524 = vrot.lane.b32.xlu1 %v954_v10, %s1475_s24  ;;  %508 = vrot.lane.b32.xlu0 %v954_v10, %s1476_s0 }
 0x181   : > { %v972_v13 = vpop.f32.mrf.mxu0 }
 0x182   : > { %503 = vst.msk [vmem:[#allocation2] sm:$0xf] %vm502_vm2, %v501_v12 }
 0x184   : > { %544 = vrot.lane.b32.xlu1 %v954_v10, %s1477_s23  ;;  %512 = vrot.lane.b32.xlu0 %v954_v10, %s1478_s18 }
 0x188   : > { %529 = vrot.lane.b32.xlu0 %v954_v10, %s1479_s8  ;;  %519 = vrot.lane.b32.xlu1 %v501_v12, %s1480_s2 }
 0x18c   : > { %539 = vrot.lane.b32.xlu0 %v954_v10, %s1481_s22  ;;  %534 = vrot.lane.b32.xlu1 %v501_v12, %s1482_s10 }
 0x190   : > { %549 = vrot.lane.b32.xlu0 %v501_v12, %s1483_s4  ;;  %554 = vrot.lane.b32.xlu1 %v954_v10, %s1484_s3 }
 0x194   : > { %559 = vrot.lane.b32.xlu0 %v954_v10, %s1485_s30 }
 0x1f2   : > { %v525_v14 = vpop.permute.xlu1 %524  ;;  %v509_v15 = vpop.permute.xlu0 %508 }
 0x1f3   : > { %528 = vst.msk [vmem:[#allocation3 + $0x4] sm:$0xf] %vm502_vm2, %v525_v14  ;;  %511 = vst.msk [vmem:[#allocation3] sm:$0xf] %vm502_vm2, %v509_v15 }
 0x1f6   : > { %v545_v16 = vpop.permute.xlu1 %544  ;;  %v513_v17 = vpop.permute.xlu0 %512 }
 0x1f7   : > { %548 = vst.msk [vmem:[#allocation4 + $0x8] sm:$0xf] %vm502_vm2, %v545_v16  ;;  %515 = vst.msk [vmem:[#allocation4] sm:$0xf] %vm502_vm2, %v513_v17 }
 0x1fa   : > { %v530_v18 = vpop.permute.xlu0 %529  ;;  %v520_v19 = vpop.permute.xlu1 %519 }
 0x1fb   : > { %533 = vst.msk [vmem:[#allocation4 + $0x4] sm:$0xf] %vm502_vm2, %v530_v18  ;;  %523 = vst.msk [vmem:[#allocation2 + $0x4] sm:$0xf] %vm502_vm2, %v520_v19 }
 0x1fe   : > { %v540_v20 = vpop.permute.xlu0 %539  ;;  %v535_v21 = vpop.permute.xlu1 %534 }
 0x1ff   : > { %543 = vst.msk [vmem:[#allocation3 + $0x8] sm:$0xf] %vm502_vm2, %v540_v20  ;;  %538 = vst.msk [vmem:[#allocation2 + $0x8] sm:$0xf] %vm502_vm2, %v535_v21 }
 0x202   : > { %v550_v22 = vpop.permute.xlu0 %549  ;;  %v555_v23 = vpop.permute.xlu1 %554 }
 0x203   : > { %553 = vst.msk [vmem:[#allocation2 + $0xc] sm:$0xf] %vm502_vm2, %v550_v22  ;;  %558 = vst.msk [vmem:[#allocation3 + $0xc] sm:$0xf] %vm502_vm2, %v555_v23 }
 0x206   : > { %v560_v24 = vpop.permute.xlu0 %559 }
 0x207   : > { %563 = vst.msk [vmem:[#allocation4 + $0xc] sm:$0xf] %vm502_vm2, %v560_v24 }
 0x208 PF: > { %s2037_s24 = sld [smem:[#allocation23_spill]]  ;;  %vm582_vm3 = vcmask 64512   ;;  %v1486_v25 = vmov 0.0   ;;  %vm1487_vm4 = vmmov 0   ;;  %v581_v29 = vld [vmem:[%s372_s15] sm:$0xff]  ;;  %v629_v31 = vld [vmem:[%s1821_s1] sm:$0xff] }
 0x209   : > { %973 = vmatprep.subr.bf16.mxu0 %v1486_v25  ;;  %975 = vmatprep.mubr.msk.bf16.mxu0 %vm1487_vm4, %v1486_v25  ;;  %vm646_vm5 = vcmask 1043456   ;;  %s2038_s15 = sld [smem:[#allocation24_spill]]  ;;  %v691_v47 = vld [vmem:[%s363_s16] sm:$0xf]  ;;  %v738_v56 = vld [vmem:[%s1827_s19] sm:$0xff]  ;;  %s756_s16 = sshll.u32 %s1827_s19, 4  ;;  %s1878_s16 = int_to_ptr.vmem [resolvable:$true] %s756_s16 }
 0x20a   : > { %979 = vmatprep.subr.bf16.mxu1 %v1486_v25  ;;  %981 = vmatprep.mubr.msk.bf16.mxu1 %vm1487_vm4, %v1486_v25  ;;  %v696_v49 = vsel %vm646_vm5, %v691_v47, 0  ;;  %s2039_s1 = sld [smem:[#allocation26_spill]]  ;;  %vm740_vm6 = vcmask 261120   ;;  %s743_s4 = scalar_lea.sflag [#allocation7], %s1791_s7 }
 0x20b   : > { %s2040_s22 = sld [smem:[#allocation36_spill]]  ;;  %s1304_s3 = scalar_lea.vmem %s1878_s16, 128 }
 0x20c   : > { %p1305_p7 = scmp.ne.s32.totalorder %s1878_s16, %s1304_s3  ;;  %s1488_s30 = smov [#allocation13]  }
 0x20e   : > { %s1851_s0 = sshll.u32 %s2037_s24, 2  ;;  %s1308_s24 = sshll.u32 %s1488_s30, 4  ;;  %s1309_s24 = int_to_ptr.vmem [resolvable:$false] %s1308_s24 }
 0x20f   : > { %s576_s23 = scalar_lea.vmem [#allocation3], %s1851_s0  ;;  %s573_s18 = scalar_lea.vmem [#allocation2], %s1851_s0 }
 0x210   : > { %v577_v26 = vld [vmem:[%s576_s23] sm:$0xf]  ;;  %s579_s20 = scalar_lea.vmem [#allocation4], %s1851_s0  ;;  %s951_s27 = sshll.u32 %s2038_s15, 7 }
 0x211   : > { %v587_v27 = vsel %vm582_vm3, %v577_v26, 0  ;;  %v574_v28 = vld [vmem:[%s573_s18] sm:$0xf]  ;;  %s1876_s10 = scalar_lea.hbm %s2040_s22, %s951_s27  ;;  %p2041_p4 = scmp.ne.s32.totalorder %s2039_s1, 0 }
 0x212   : > { %974 = vmatpush3.bf16.xpose.msra.mxu0 %v587_v27  ;;  %v580_v43 = vld [vmem:[%s579_s20] sm:$0xf]  ;;  %s1310_s0 = scalar_lea.vmem %s1309_s24, 256  ;;  %p1311_p1 = scmp.lt.s32.totalorder %s1878_s16, %s1309_s24 }
 0x213   : > { %v648_v44 = vsel %vm646_vm5, %v580_v43, 0  ;;  %p1306_p5 = pnand %p1305_p7, %p2041_p4  ;;  %p1312_p3 = scmp.lt.s32.totalorder %s1310_s0, %s1304_s3 }
 0x214   : > { %980 = vmatpush3.bf16.msra.mxu1 %v648_v44 }
 0x215   : > { %985 = vmatprep.subr.bf16.mxu1 %v1486_v25  ;;  %p1307_p13 = pneg %p1306_p5  ;;  %p1313_p9 = por %p1312_p3, %p1311_p1 }
 0x217   : > { %p1314_p12 = pnand %p1313_p9, %p1307_p13 }
 0x219   : > { %976 = vmatmul.mubr.msk.bf16.vlgmr.msra.gmra.mxu0 %vm582_vm3, %v574_v28 }
 0x2d9   : > { %v623_v30 = vpop.f32.mrf.mxu0 }
 0x2da   : > { %v624_v32 = vadd.f32 %v623_v30, %v581_v29 }
 0x2db   : > { %v977_v33 = vpop.f32.mrf.mxu0 }
 0x2dc   : > { %v630_v34 = vadd.f32 %v629_v31, %v624_v32 }
 0x2dd   : > { %v626_v35 = vpop.f32.mrf.mxu0 }
 0x2de   : > { %v631_v36 = vsel %vm582_vm3, %v630_v34, -inf }
 0x2df   : > { %632 = vmax.xlane.f32.xlu0 %v631_v36  ;;  %v978_v37 = vpop.f32.mrf.mxu0 }
 0x368   : > { %v633_v38 = vpop.xlane.xlu0 %632 }
 0x369   : > { %v634_v39 = vsub.f32 %v630_v34, %v633_v38 }
 0x36b   : > { %v635_v40 = vmul.f32 1.442695, %v634_v39 }
 0x36d   : > { %1162 = vpow2.f32 %v635_v40 }
 0x37a   : > { %v1163_v41 = vpop.eup %1162 }
 0x37b   : > { %v637_v42 = vsel %vm582_vm3, %v1163_v41, 0.0 }
 0x37c   : > { %638 = vadd.xlane.f32.xlu0 %v637_v42 }
 0x405   : > { %v639_v45 = vpop.xlane.xlu0 %638 }
 0x406   : > { %1164 = vrcp.f32 %v639_v45 }
 0x413   : > { %v1165_v46 = vpop.eup %1164 }
 0x414   : > { %v641_v48 = vmul.f32 %v1165_v46, %v1163_v41 }
 0x416   : > { %v642_v50 = vpack.c.bf16 %v641_v48, %v641_v48 }
 0x418   : > { %982 = vmatmul.mubr.msk.bf16.vlgmr.msra.gmra.mxu1 %vm582_vm3, %v642_v50 }
 0x419   : > { %986 = vmatpush3.bf16.msra.mxu1 %v696_v49  ;;  %987 = vmatprep.mubr.msk.bf16.mxu1 %vm1487_vm4, %v1486_v25 }
 0x4d8   : > { %v684_v51 = vpop.f32.mrf.mxu1 }
 0x4d9   : > { %v690_v52 = vpack.c.bf16 %v684_v51, %v684_v51 }
 0x4da   : > { %v983_v53 = vpop.f32.mrf.mxu1 }
 0x4db   : > { %988 = vmatmul.mubr.msk.bf16.vlgmr.msra.gmra.mxu1 %vm582_vm3, %v690_v52 }
 0x4dc   : > { %v687_v54 = vpop.f32.mrf.mxu1 }
 0x4de   : > { %v984_v55 = vpop.f32.mrf.mxu1 }
 0x59b   : > { %v732_v57 = vpop.f32.mrf.mxu1 }
 0x59c   : > { %v739_v58 = vadd.f32 %v738_v56, %v732_v57 }
 0x59d   : > { %v989_v59 = vpop.f32.mrf.mxu1 }
 0x59e   : > { %741 = vst.msk [vmem:[%s1827_s19] sm:$0xff] %vm740_vm6, %v739_v58 }
 0x59f   : > { %v735_v60 = vpop.f32.mrf.mxu1 }
 0x5a0   : > { %1317 = shalt.err (!%p1314_p12)
}
 0x5a1   : > { %s1318_s19 = scalar_lea.hbm %s1876_s10, 128  ;;  %s1322_s18 = scalar_lea.hbm %s2040_s22, 256 }
 0x5a2   : > { %p1319_p8 = scmp.ne.s32.totalorder %s1876_s10, %s1318_s19  ;;  %p1323_p0 = scmp.lt.s32.totalorder %s1876_s10, %s2040_s22 }
 0x5a3   : > { %p1324_p10 = scmp.lt.s32.totalorder %s1322_s18, %s1318_s19 }
 0x5a4   : > { %p1320_p11 = pnand %p1319_p8, %p2041_p4 }
 0x5a5   : > { %p1325_p6 = por %p1324_p10, %p1323_p0 }
 0x5a6   : > { %p1321_p2 = pneg %p1320_p11 }
 0x5a8   : > { %p1326_p7 = pnand %p1325_p6, %p1321_p2 }
 0x5aa   : > { %1329 = shalt.err (!%p1326_p7)
}
 0x5ab   : > { %1003 = dma.vmem_to_hbm [thread:$0]  (%p2041_p4), %s1878_s16, 128, %s1876_s10, %s743_s4   ;;  %v990_v61 = vpop.f32.mrf.mxu1 }
 0x5ac PF: > { %s2042_s27 = sld [smem:[#allocation21_spill]]  ;;  %p1029_p5 = scmp.ge.s32.totalorder %s1464_s14, 2 }
 0x5ad   : > { %s2043_s8 = sld [smem:[#allocation27_spill]] }
 0x5b2   : > { %s768_s2 = sand.u32 1, %s2042_s27  }
 0x5b3   : > { %p2044_p13 = scmp.ne.s32.totalorder %s2043_s8, 0  ;;  %s769_s3 = scalar_lea.sflag [#allocation7], %s768_s2 }
 0x5b5   : > { %p1023_p1 = pnand %p1029_p5, %p2044_p13 }
 0x5b7   : > { %p1024_p3 = pneg %p1023_p1 }
 0x5b9   : > { %1407 = dma.done.wait (%p1024_p3), %s769_s3, 128  }
 0x5ba   : > { %1409 = vsyncadd (%p1024_p3), %s769_s3, 4294967168  ;;  %s24_s14 = sadd.s32 1, %s1464_s14   ;;  %s2046_s27 = sld [smem:[#allocation20_spill]] }
 0x5bb   : > { %p1907_p9 = scmp.ge.s32.totalorder %s24_s14, 10   ;;  %s2047_s30 = sld [smem:[#allocation22_spill]] }
 0x5bc   : > { %s2048_s16 = sld [smem:[#allocation29_spill]]  ;;  %s2049_s24 = smov %s1416_s25 }
 0x5bd   : > { %s2050_s25 = smov %s1420_s26  ;;  %s2051_s26 = smov %s1722_s28 }
 0x5be   : > { %s2052_s28 = smov %s1432_s29  ;;  %s2053_s29 = smov %s1686_s11 }
 0x5bf   : > { %s2054_s8 = smov %s1444_s9  ;;  %s2055_s9 = smov %s1697_s17 }
 0x5c0   : > { %s2056_s10 = smov %s1456_s12  ;;  %s2057_s11 = smov %s1460_s13 }
 0x5c1   : > { %s2059_s13 = smov %s2065_s21  ;;  %23 = sbr.rel (!%p1907_p9) target bundleno = 18 (0x12), region = 146 }
 0x5c2   : > { %s2058_s12 = smov %s2048_s16 }
 0x5c6   :  { %774 = vsyncpa [#allocation6], 1 }
 0x5c7   :  { %776 = vsyncpa [#allocation6 + $0x1], 1 }
 0x5c8   :  { %777 = vsyncpa [#allocation9], 1 }
 0x5c9   :  { %778 = vsyncpa [#allocation7], 1 }
 0x5ca   :  { %780 = vsyncpa [#allocation7 + $0x1], 1 }

</bundles_post_ra>
